<compile_context>
chip_gen: v6e
topology: v6e:2x2x1
jax: 0.10.0
libtpu: 0.0.40
codegen_flags: <defaults>
</compile_context>

<pallas_src>
import functools

import jax
import jax.numpy as jnp
from jax.experimental import pallas as pl
from jax.experimental.pallas import tpu as pltpu


# ---------------------------------------------------------------------------
# Wrapper-side weight preprocessing (plain JAX, done once per call)
# ---------------------------------------------------------------------------
def _band_conv_weights(w9, cin, cout, width):
    """(9, cin, cout) 3x3 taps -> (3, width*cin, width*cout) banded matrices.

    Band dy reproduces one kernel row of a stride-1, pad-1 conv along W:
      out[:, w*cout + co] = sum_{wi, ci} patch[:, wi*cin + ci] * band[dy][...]
    Out-of-range horizontal taps are zero, i.e. the W zero-padding is folded
    into the weights.
    """
    w = w9.reshape(3, 3, cin, cout)
    wi = jnp.arange(width)[:, None]            # input column index
    wo = jnp.arange(width)[None, :]            # output column index
    dx = wi - wo + 1                           # horizontal tap index
    mask = ((dx >= 0) & (dx <= 2)).astype(w9.dtype)
    blocks = w[:, jnp.clip(dx, 0, 2)] * mask[None, :, :, None, None]
    return blocks.transpose(0, 1, 3, 2, 4).reshape(3, width * cin, width * cout)


def _band_pointwise_weight(wd, cin, cout, width):
    """(cin, cout) 1x1 conv -> (width*cin, width*cout) block-diagonal matrix."""
    eye = jnp.eye(width, dtype=wd.dtype)
    blocks = eye[:, :, None, None] * wd[None, None]          # (W, W, cin, cout)
    return blocks.transpose(0, 2, 1, 3).reshape(width * cin, width * cout)


# ---------------------------------------------------------------------------
# Kernel
# ---------------------------------------------------------------------------
def _residual_block_kernel(x_ref, emb_ref, wt1_ref, wt2_ref,
                           g1_ref, be1_ref, g2_ref, be2_ref,
                           bd_ref, we_ref, bemb_ref,
                           out_ref, *, B, H, W, Cin, Cout, mxu_dtype):
    wcin, wcout = W * Cin, W * Cout
    inv_n = 1.0 / float(B * H * W)
    eps = 1e-5

    def silu(t):
        # exp and the approximate reciprocal both run on the (otherwise idle)
        # EUP slot instead of a VALU divide.
        return t * pl.reciprocal(1.0 + jnp.exp(-t), approx=True)

    # 0/1 matrix summing the W column-groups of a (., W*Cout) row vector and
    # broadcasting the per-channel totals back in channel-tiled layout.
    # Generated in-kernel (2-D iota + mod compare) instead of a 64 KiB HBM DMA;
    # computed once and reused by both BatchNorms.
    li = jax.lax.broadcasted_iota(jnp.int32, (wcout, wcout), 0)
    lj = jax.lax.broadcasted_iota(jnp.int32, (wcout, wcout), 1)
    m_bcast = (li % Cout == lj % Cout).astype(jnp.float32)

    def batch_norm(acc, gamma_t, beta_t):
        # Training-mode BatchNorm2d over the full (B, H, W) extent.  Sum and
        # sum-of-squares are stacked so the W-group reduction + channel-tiled
        # broadcast is a single small f32 matmul (stays lane-dense, no
        # reshapes / relayouts).
        s = jnp.sum(acc, axis=0, keepdims=True)                   # (1, W*Cout)
        ss = jnp.sum(acc * acc, axis=0, keepdims=True)            # (1, W*Cout)
        red = jnp.dot(jnp.concatenate([s, ss], axis=0), m_bcast,
                      preferred_element_type=jnp.float32) * inv_n  # (2, W*Cout)
        mean, msq = red[0:1, :], red[1:2, :]
        var = msq - mean * mean
        return (acc - mean) * jax.lax.rsqrt(var + eps) * gamma_t + beta_t

    # ---- conv1 (3x3) as ONE fused K = 3*W*Cin MXU matmul.  x arrives
    #      H-halo-padded and already bf16; the three dy bands, the horizontal
    #      taps, the W zero-padding and the 1x1 downsample (extra output
    #      columns) are all folded into wt1.  Conv bias omitted (exactly
    #      cancelled by the training-mode BatchNorm mean subtraction). ----
    patch1 = jnp.concatenate(
        [x_ref[:, d:d + H, :].reshape(B * H, wcin) for d in range(3)], axis=-1)
    accw = jnp.dot(patch1, wt1_ref[...],
                   preferred_element_type=jnp.float32)            # (B*H, 2*W*Cout)
    acc1 = accw[:, :wcout]
    res = accw[:, wcout:] + bd_ref[...]

    # ---- BatchNorm (batch stats) + SiLU ----
    y1 = silu(batch_norm(acc1, g1_ref[...], be1_ref[...]))

    # ---- conv2 (3x3): shifted-row operands built in-register (no VMEM
    #      scratch round-trip); per-batch zero rows handle the H boundary. ----
    y1_3d = y1.reshape(B, H, wcout)
    zrow = jnp.zeros((B, 1, wcout), jnp.float32)
    up = jnp.concatenate([zrow, y1_3d[:, :H - 1, :]], axis=1)     # row h-1
    dn = jnp.concatenate([y1_3d[:, 1:, :], zrow], axis=1)         # row h+1
    patch2 = (jnp.concatenate([up, y1_3d, dn], axis=-1)
              .reshape(B * H, 3 * wcout).astype(mxu_dtype))
    y2 = batch_norm(jnp.dot(patch2, wt2_ref[...],
                            preferred_element_type=jnp.float32),
                    g2_ref[...], be2_ref[...])

    # ---- embedding branch: Linear + SiLU (weights pre-tiled along W) ----
    e = silu(jnp.dot(emb_ref[...], we_ref[...],
                     preferred_element_type=jnp.float32) + bemb_ref[...])

    # ---- sum + final SiLU; lane-dense (B, H, W*Cout) store ----
    out = (y2 + res).reshape(B, H, wcout) + e[:, None, :]
    out_ref[...] = silu(out).astype(out_ref.dtype)


# ---------------------------------------------------------------------------
# Wrapper: NCHW in / NCHW out, matching the PyTorch module
# ---------------------------------------------------------------------------
def residual_block(x_nchw, emb, params, *, mxu_dtype=jnp.bfloat16):
    B, Cin, H, W = x_nchw.shape
    Cout = params["w1"].shape[-1]
    wcin, wcout = W * Cin, W * Cout

    # Banded conv weights with the three dy bands fused along K; the 1x1
    # downsample is folded into conv1's extra output columns.
    wt1 = _band_conv_weights(params["w1"], Cin, Cout, W)          # (3, W*Cin, W*Cout)
    wdb = _band_pointwise_weight(params["wd"], Cin, Cout, W)      # (W*Cin, W*Cout)
    zer = jnp.zeros_like(wdb)
    wt1x = (jnp.concatenate([wt1, jnp.stack([zer, wdb, zer])], axis=-1)
            .reshape(3 * wcin, 2 * wcout).astype(mxu_dtype))      # (3*W*Cin, 2*W*Cout)
    wt2 = (_band_conv_weights(params["w2"], Cout, Cout, W)
           .reshape(3 * wcout, wcout).astype(mxu_dtype))          # (3*W*Cout, W*Cout)

    # per-channel parameters pre-tiled to the (W*Cout) lane layout
    tile_c = lambda v: jnp.tile(v.reshape(1, Cout), (1, W)).astype(jnp.float32)
    g1_t, be1_t = tile_c(params["g1"]), tile_c(params["be1"])
    g2_t, be2_t = tile_c(params["g2"]), tile_c(params["be2"])
    bd_t, bemb_t = tile_c(params["bd"]), tile_c(params["bemb"])
    we_t = jnp.tile(params["we"], (1, W)).astype(jnp.float32)     # (E, W*Cout)

    # NCHW -> (B, H+2, W*Cin): row-major-pixel layout (channels minor on
    # lanes), H halo pre-padded in the wrapper (trivially fused XLA op),
    # cast once to bf16 to halve the HBM->VMEM DMA and feed the MXU directly.
    x_rows = jnp.transpose(x_nchw, (0, 2, 3, 1)).reshape(B, H, wcin)
    x_rows = jnp.pad(x_rows, ((0, 0), (1, 1), (0, 0))).astype(mxu_dtype)

    kernel = functools.partial(_residual_block_kernel, B=B, H=H, W=W,
                               Cin=Cin, Cout=Cout, mxu_dtype=mxu_dtype)

    out_rows = pl.pallas_call(
        kernel,
        out_shape=jax.ShapeDtypeStruct((B, H, wcout), jnp.float32),
        in_specs=[pl.BlockSpec(memory_space=pltpu.MemorySpace.VMEM)] * 11,
        out_specs=pl.BlockSpec(memory_space=pltpu.MemorySpace.VMEM),
        compiler_params=pltpu.CompilerParams(
            vmem_limit_bytes=32 * 1024 * 1024),
    )(x_rows, emb.astype(jnp.float32), wt1x, wt2,
      g1_t, be1_t, g2_t, be2_t, bd_t, we_t, bemb_t)

    return jnp.transpose(out_rows.reshape(B, H, W, Cout), (0, 3, 1, 2))


# ---------------------------------------------------------------------------
# Pure-JAX f32 reference with identical math (for the correctness check)
# ---------------------------------------------------------------------------
def reference(x_nchw, emb, params):
    x = jnp.transpose(x_nchw, (0, 2, 3, 1)).astype(jnp.float32)

    def conv3x3(inp, w9, b):
        ci, co = w9.shape[1], w9.shape[2]
        w = w9.reshape(3, 3, ci, co)
        y = jax.lax.conv_general_dilated(
            inp, w, window_strides=(1, 1), padding="SAME",
            dimension_numbers=("NHWC", "HWIO", "NHWC"))
        return y + b[0]

    def bn(y, g, be):
        m = jnp.mean(y, axis=(0, 1, 2), keepdims=True)
        v = jnp.mean((y - m) ** 2, axis=(0, 1, 2), keepdims=True)
        return (y - m) * jax.lax.rsqrt(v + 1e-5) * g[0] + be[0]

    silu = lambda t: t * jax.nn.sigmoid(t)

    y1 = silu(bn(conv3x3(x, params["w1"], params["b1"]),
                 params["g1"], params["be1"]))
    y2 = bn(conv3x3(y1, params["w2"], params["b2"]),
            params["g2"], params["be2"])
    res = jnp.einsum("bhwi,io->bhwo", x, params["wd"]) + params["bd"][0]
    e = silu(emb.astype(jnp.float32) @ params["we"] + params["bemb"][0])
    out = silu(y2 + res + e[:, None, None, :])
    return jnp.transpose(out, (0, 3, 1, 2))


if __name__ == "__main__":
    B, Cin, Cout, H, W, E = 2, 4, 8, 16, 16, 32

    key = jax.random.PRNGKey(0)
    ks = jax.random.split(key, 16)
    params = {
        "w1":   0.1 * jax.random.normal(ks[0], (9, Cin, Cout), jnp.float32),
        "b1":   0.1 * jax.random.normal(ks[1], (1, Cout), jnp.float32),
        "g1":   1.0 + 0.1 * jax.random.normal(ks[2], (1, Cout), jnp.float32),
        "be1":  0.1 * jax.random.normal(ks[3], (1, Cout), jnp.float32),
        "w2":   0.1 * jax.random.normal(ks[4], (9, Cout, Cout), jnp.float32),
        "b2":   0.1 * jax.random.normal(ks[5], (1, Cout), jnp.float32),
        "g2":   1.0 + 0.1 * jax.random.normal(ks[6], (1, Cout), jnp.float32),
        "be2":  0.1 * jax.random.normal(ks[7], (1, Cout), jnp.float32),
        "wd":   0.1 * jax.random.normal(ks[8], (Cin, Cout), jnp.float32),
        "bd":   0.1 * jax.random.normal(ks[9], (1, Cout), jnp.float32),
        "we":   0.1 * jax.random.normal(ks[10], (E, Cout), jnp.float32),
        "bemb": 0.1 * jax.random.normal(ks[11], (1, Cout), jnp.float32),
    }
    x = jax.random.normal(ks[12], (B, Cin, H, W), jnp.float32)
    emb = jax.random.normal(ks[13], (B, E), jnp.float32)

    out = jax.block_until_ready(residual_block(x, emb, params))
    assert out.shape == (B, Cout, H, W), out.shape

    ref = reference(x, emb, params)
    max_err = float(jnp.max(jnp.abs(out - ref)))
    # bf16 MXU operands + approximate-EUP sigmoid -> looser tolerance than f32.
    assert jnp.allclose(out, ref, atol=5e-2, rtol=5e-2), max_err

    print("KERNEL_OK")
</pallas_src>

<mosaic_0001>
module attributes {stable_mosaic.version = 11 : i64} {
  func.func @_residual_block_kernel(%arg0: memref<2x18x64xbf16, #tpu.memory_space<vmem>>, %arg1: memref<2x32xf32, #tpu.memory_space<vmem>>, %arg2: memref<192x256xbf16, #tpu.memory_space<vmem>>, %arg3: memref<384x128xbf16, #tpu.memory_space<vmem>>, %arg4: memref<1x128xf32, #tpu.memory_space<vmem>>, %arg5: memref<1x128xf32, #tpu.memory_space<vmem>>, %arg6: memref<1x128xf32, #tpu.memory_space<vmem>>, %arg7: memref<1x128xf32, #tpu.memory_space<vmem>>, %arg8: memref<1x128xf32, #tpu.memory_space<vmem>>, %arg9: memref<32x128xf32, #tpu.memory_space<vmem>>, %arg10: memref<1x128xf32, #tpu.memory_space<vmem>>, %arg11: memref<2x16x128xf32, #tpu.memory_space<vmem>>) attributes {dimension_semantics = [], scalar_prefetch = 0 : i64, scratch_operands = 0 : i64, tpu.core_type = #tpu.core_type<tc>} {
    %0 = tpu.iota {dimensions = array<i32: 0>} : vector<128x128xi32>
    %1 = tpu.iota {dimensions = array<i32: 1>} : vector<128x128xi32>
    %c8_i32 = arith.constant 8 : i32
    %c0_i32 = arith.constant 0 : i32
    %2 = arith.cmpi eq, %c8_i32, %c0_i32 : i32
    %c1_i32 = arith.constant 1 : i32
    %3 = arith.select %2, %c1_i32, %c8_i32 : i32
    %4 = vector.broadcast %3 : i32 to vector<128x128xi32>
    %5 = arith.remsi %0, %4 : vector<128x128xi32>
    %c0_i32_0 = arith.constant 0 : i32
    %6 = vector.broadcast %c0_i32_0 : i32 to vector<128x128xi32>
    %7 = arith.cmpi ne, %5, %6 : vector<128x128xi32>
    %c0_i32_1 = arith.constant 0 : i32
    %8 = vector.broadcast %c0_i32_1 : i32 to vector<128x128xi32>
    %9 = arith.cmpi slt, %5, %8 : vector<128x128xi32>
    %c0_i32_2 = arith.constant 0 : i32
    %10 = arith.cmpi slt, %3, %c0_i32_2 : i32
    %11 = vector.broadcast %10 : i1 to vector<128x128xi1>
    %12 = vector.broadcast %11 : vector<128x128xi1> to vector<128x128xi1>
    %13 = arith.xori %9, %12 : vector<128x128xi1>
    %14 = arith.andi %13, %7 : vector<128x128xi1>
    %15 = vector.broadcast %3 : i32 to vector<128x128xi32>
    %16 = arith.addi %5, %15 : vector<128x128xi32>
    %17 = arith.select %14, %16, %5 : vector<128x128xi1>, vector<128x128xi32>
    %c8_i32_3 = arith.constant 8 : i32
    %c0_i32_4 = arith.constant 0 : i32
    %18 = arith.cmpi eq, %c8_i32_3, %c0_i32_4 : i32
    %c1_i32_5 = arith.constant 1 : i32
    %19 = arith.select %18, %c1_i32_5, %c8_i32_3 : i32
    %20 = vector.broadcast %19 : i32 to vector<128x128xi32>
    %21 = arith.remsi %1, %20 : vector<128x128xi32>
    %c0_i32_6 = arith.constant 0 : i32
    %22 = vector.broadcast %c0_i32_6 : i32 to vector<128x128xi32>
    %23 = arith.cmpi ne, %21, %22 : vector<128x128xi32>
    %c0_i32_7 = arith.constant 0 : i32
    %24 = vector.broadcast %c0_i32_7 : i32 to vector<128x128xi32>
    %25 = arith.cmpi slt, %21, %24 : vector<128x128xi32>
    %c0_i32_8 = arith.constant 0 : i32
    %26 = arith.cmpi slt, %19, %c0_i32_8 : i32
    %27 = vector.broadcast %26 : i1 to vector<128x128xi1>
    %28 = vector.broadcast %27 : vector<128x128xi1> to vector<128x128xi1>
    %29 = arith.xori %25, %28 : vector<128x128xi1>
    %30 = arith.andi %29, %23 : vector<128x128xi1>
    %31 = vector.broadcast %19 : i32 to vector<128x128xi32>
    %32 = arith.addi %21, %31 : vector<128x128xi32>
    %33 = arith.select %30, %32, %21 : vector<128x128xi1>, vector<128x128xi32>
    %34 = arith.cmpi eq, %17, %33 : vector<128x128xi32>
    %35 = arith.extui %34 : vector<128x128xi1> to vector<128x128xi32>
    %36 = arith.sitofp %35 : vector<128x128xi32> to vector<128x128xf32>
    %c0 = arith.constant 0 : index
    %c0_9 = arith.constant 0 : index
    %c0_10 = arith.constant 0 : index
    %37 = vector.load %arg0[%c0, %c0_9, %c0_10] : memref<2x18x64xbf16, #tpu.memory_space<vmem>>, vector<2x16x64xbf16>
    %38 = vector.shape_cast %37 : vector<2x16x64xbf16> to vector<32x64xbf16>
    %c0_11 = arith.constant 0 : index
    %c1 = arith.constant 1 : index
    %c0_12 = arith.constant 0 : index
    %39 = vector.load %arg0[%c0_11, %c1, %c0_12] : memref<2x18x64xbf16, #tpu.memory_space<vmem>>, vector<2x16x64xbf16>
    %40 = vector.shape_cast %39 : vector<2x16x64xbf16> to vector<32x64xbf16>
    %c0_13 = arith.constant 0 : index
    %c2 = arith.constant 2 : index
    %c0_14 = arith.constant 0 : index
    %41 = vector.load %arg0[%c0_13, %c2, %c0_14] : memref<2x18x64xbf16, #tpu.memory_space<vmem>>, vector<2x16x64xbf16>
    %42 = vector.shape_cast %41 : vector<2x16x64xbf16> to vector<32x64xbf16>
    %43 = tpu.concatenate %38, %40, %42 in 1 : vector<32x64xbf16>, vector<32x64xbf16>, vector<32x64xbf16> -> vector<32x192xbf16>
    %c0_15 = arith.constant 0 : index
    %c0_16 = arith.constant 0 : index
    %44 = vector.load %arg2[%c0_15, %c0_16] : memref<192x256xbf16, #tpu.memory_space<vmem>>, vector<192x256xbf16>
    %cst = arith.constant dense<0.000000e+00> : vector<32x256xf32>
    %45 = tpu.matmul %43, %44, %cst {dimension_numbers = #tpu.dot_dimension_numbers<[1], [0], [0], [1], [0, 0, 1, 1], [], []>} : vector<32x192xbf16>, vector<192x256xbf16>, vector<32x256xf32> -> vector<32x256xf32>
    %46 = vector.extract_strided_slice %45 {offsets = [0, 0], sizes = [32, 128], strides = [1, 1]} : vector<32x256xf32> to vector<32x128xf32>
    %47 = vector.extract_strided_slice %45 {offsets = [0, 128], sizes = [32, 128], strides = [1, 1]} : vector<32x256xf32> to vector<32x128xf32>
    %c0_17 = arith.constant 0 : index
    %c0_18 = arith.constant 0 : index
    %48 = vector.load %arg8[%c0_17, %c0_18] : memref<1x128xf32, #tpu.memory_space<vmem>>, vector<1x128xf32>
    %49 = vector.broadcast %48 : vector<1x128xf32> to vector<32x128xf32>
    %50 = arith.addf %47, %49 : vector<32x128xf32>
    %c0_19 = arith.constant 0 : index
    %c0_20 = arith.constant 0 : index
    %51 = vector.load %arg4[%c0_19, %c0_20] : memref<1x128xf32, #tpu.memory_space<vmem>>, vector<1x128xf32>
    %c0_21 = arith.constant 0 : index
    %c0_22 = arith.constant 0 : index
    %52 = vector.load %arg5[%c0_21, %c0_22] : memref<1x128xf32, #tpu.memory_space<vmem>>, vector<1x128xf32>
    %cst_23 = arith.constant dense<0.000000e+00> : vector<128xf32>
    %53 = vector.multi_reduction <add>, %46, %cst_23 [0] : vector<32x128xf32> to vector<128xf32>
    %54 = vector.shape_cast %53 : vector<128xf32> to vector<1x128xf32>
    %55 = arith.mulf %46, %46 : vector<32x128xf32>
    %cst_24 = arith.constant dense<0.000000e+00> : vector<128xf32>
    %56 = vector.multi_reduction <add>, %55, %cst_24 [0] : vector<32x128xf32> to vector<128xf32>
    %57 = vector.shape_cast %56 : vector<128xf32> to vector<1x128xf32>
    %58 = tpu.concatenate %54, %57 in 0 : vector<1x128xf32>, vector<1x128xf32> -> vector<2x128xf32>
    %cst_25 = arith.constant dense<0.000000e+00> : vector<2x128xf32>
    %59 = tpu.matmul %58, %36, %cst_25 {dimension_numbers = #tpu.dot_dimension_numbers<[1], [0], [0], [1], [0, 0, 1, 1], [], []>} : vector<2x128xf32>, vector<128x128xf32>, vector<2x128xf32> -> vector<2x128xf32>
    %cst_26 = arith.constant 0.001953125 : f32
    %60 = vector.broadcast %cst_26 : f32 to vector<2x128xf32>
    %61 = arith.mulf %59, %60 : vector<2x128xf32>
    %62 = vector.extract_strided_slice %61 {offsets = [0, 0], sizes = [1, 128], strides = [1, 1]} : vector<2x128xf32> to vector<1x128xf32>
    %63 = vector.extract_strided_slice %61 {offsets = [1, 0], sizes = [1, 128], strides = [1, 1]} : vector<2x128xf32> to vector<1x128xf32>
    %64 = arith.mulf %62, %62 : vector<1x128xf32>
    %65 = arith.subf %63, %64 : vector<1x128xf32>
    %66 = vector.broadcast %62 : vector<1x128xf32> to vector<32x128xf32>
    %67 = arith.subf %46, %66 : vector<32x128xf32>
    %cst_27 = arith.constant 9.99999974E-6 : f32
    %68 = vector.broadcast %cst_27 : f32 to vector<1x128xf32>
    %69 = arith.addf %65, %68 : vector<1x128xf32>
    %70 = math.rsqrt %69 : vector<1x128xf32>
    %71 = vector.broadcast %70 : vector<1x128xf32> to vector<32x128xf32>
    %72 = arith.mulf %67, %71 : vector<32x128xf32>
    %73 = vector.broadcast %51 : vector<1x128xf32> to vector<32x128xf32>
    %74 = arith.mulf %72, %73 : vector<32x128xf32>
    %75 = vector.broadcast %52 : vector<1x128xf32> to vector<32x128xf32>
    %76 = arith.addf %74, %75 : vector<32x128xf32>
    %cst_28 = arith.constant 0.000000e+00 : f32
    %77 = vector.broadcast %cst_28 : f32 to vector<32x128xf32>
    %78 = arith.subf %77, %76 : vector<32x128xf32>
    %79 = math.exp %78 : vector<32x128xf32>
    %cst_29 = arith.constant 1.000000e+00 : f32
    %80 = vector.broadcast %cst_29 : f32 to vector<32x128xf32>
    %81 = arith.addf %80, %79 : vector<32x128xf32>
    %82 = tpu.reciprocal %81 {approx = true} : vector<32x128xf32> -> vector<32x128xf32>
    %83 = arith.mulf %76, %82 : vector<32x128xf32>
    %84 = vector.shape_cast %83 : vector<32x128xf32> to vector<2x16x128xf32>
    %cst_30 = arith.constant 0.000000e+00 : f32
    %85 = vector.broadcast %cst_30 : f32 to vector<2x1x128xf32>
    %86 = vector.extract_strided_slice %84 {offsets = [0, 0, 0], sizes = [2, 15, 128], strides = [1, 1, 1]} : vector<2x16x128xf32> to vector<2x15x128xf32>
    %87 = tpu.concatenate %85, %86 in 1 : vector<2x1x128xf32>, vector<2x15x128xf32> -> vector<2x16x128xf32>
    %88 = vector.extract_strided_slice %84 {offsets = [0, 1, 0], sizes = [2, 15, 128], strides = [1, 1, 1]} : vector<2x16x128xf32> to vector<2x15x128xf32>
    %89 = tpu.concatenate %88, %85 in 1 : vector<2x15x128xf32>, vector<2x1x128xf32> -> vector<2x16x128xf32>
    %90 = tpu.concatenate %87, %84, %89 in 2 : vector<2x16x128xf32>, vector<2x16x128xf32>, vector<2x16x128xf32> -> vector<2x16x384xf32>
    %91 = vector.shape_cast %90 : vector<2x16x384xf32> to vector<32x384xf32>
    %92 = arith.truncf %91 : vector<32x384xf32> to vector<32x384xbf16>
    %c0_31 = arith.constant 0 : index
    %c0_32 = arith.constant 0 : index
    %93 = vector.load %arg3[%c0_31, %c0_32] : memref<384x128xbf16, #tpu.memory_space<vmem>>, vector<384x128xbf16>
    %cst_33 = arith.constant dense<0.000000e+00> : vector<32x128xf32>
    %94 = tpu.matmul %92, %93, %cst_33 {dimension_numbers = #tpu.dot_dimension_numbers<[1], [0], [0], [1], [0, 0, 1, 1], [], []>} : vector<32x384xbf16>, vector<384x128xbf16>, vector<32x128xf32> -> vector<32x128xf32>
    %c0_34 = arith.constant 0 : index
    %c0_35 = arith.constant 0 : index
    %95 = vector.load %arg6[%c0_34, %c0_35] : memref<1x128xf32, #tpu.memory_space<vmem>>, vector<1x128xf32>
    %c0_36 = arith.constant 0 : index
    %c0_37 = arith.constant 0 : index
    %96 = vector.load %arg7[%c0_36, %c0_37] : memref<1x128xf32, #tpu.memory_space<vmem>>, vector<1x128xf32>
    %cst_38 = arith.constant dense<0.000000e+00> : vector<128xf32>
    %97 = vector.multi_reduction <add>, %94, %cst_38 [0] : vector<32x128xf32> to vector<128xf32>
    %98 = vector.shape_cast %97 : vector<128xf32> to vector<1x128xf32>
    %99 = arith.mulf %94, %94 : vector<32x128xf32>
    %cst_39 = arith.constant dense<0.000000e+00> : vector<128xf32>
    %100 = vector.multi_reduction <add>, %99, %cst_39 [0] : vector<32x128xf32> to vector<128xf32>
    %101 = vector.shape_cast %100 : vector<128xf32> to vector<1x128xf32>
    %102 = tpu.concatenate %98, %101 in 0 : vector<1x128xf32>, vector<1x128xf32> -> vector<2x128xf32>
    %cst_40 = arith.constant dense<0.000000e+00> : vector<2x128xf32>
    %103 = tpu.matmul %102, %36, %cst_40 {dimension_numbers = #tpu.dot_dimension_numbers<[1], [0], [0], [1], [0, 0, 1, 1], [], []>} : vector<2x128xf32>, vector<128x128xf32>, vector<2x128xf32> -> vector<2x128xf32>
    %cst_41 = arith.constant 0.001953125 : f32
    %104 = vector.broadcast %cst_41 : f32 to vector<2x128xf32>
    %105 = arith.mulf %103, %104 : vector<2x128xf32>
    %106 = vector.extract_strided_slice %105 {offsets = [0, 0], sizes = [1, 128], strides = [1, 1]} : vector<2x128xf32> to vector<1x128xf32>
    %107 = vector.extract_strided_slice %105 {offsets = [1, 0], sizes = [1, 128], strides = [1, 1]} : vector<2x128xf32> to vector<1x128xf32>
    %108 = arith.mulf %106, %106 : vector<1x128xf32>
    %109 = arith.subf %107, %108 : vector<1x128xf32>
    %110 = vector.broadcast %106 : vector<1x128xf32> to vector<32x128xf32>
    %111 = arith.subf %94, %110 : vector<32x128xf32>
    %cst_42 = arith.constant 9.99999974E-6 : f32
    %112 = vector.broadcast %cst_42 : f32 to vector<1x128xf32>
    %113 = arith.addf %109, %112 : vector<1x128xf32>
    %114 = math.rsqrt %113 : vector<1x128xf32>
    %115 = vector.broadcast %114 : vector<1x128xf32> to vector<32x128xf32>
    %116 = arith.mulf %111, %115 : vector<32x128xf32>
    %117 = vector.broadcast %95 : vector<1x128xf32> to vector<32x128xf32>
    %118 = arith.mulf %116, %117 : vector<32x128xf32>
    %119 = vector.broadcast %96 : vector<1x128xf32> to vector<32x128xf32>
    %120 = arith.addf %118, %119 : vector<32x128xf32>
    %c0_43 = arith.constant 0 : index
    %c0_44 = arith.constant 0 : index
    %121 = vector.load %arg1[%c0_43, %c0_44] : memref<2x32xf32, #tpu.memory_space<vmem>>, vector<2x32xf32>
    %c0_45 = arith.constant 0 : index
    %c0_46 = arith.constant 0 : index
    %122 = vector.load %arg9[%c0_45, %c0_46] : memref<32x128xf32, #tpu.memory_space<vmem>>, vector<32x128xf32>
    %cst_47 = arith.constant dense<0.000000e+00> : vector<2x128xf32>
    %123 = tpu.matmul %121, %122, %cst_47 {dimension_numbers = #tpu.dot_dimension_numbers<[1], [0], [0], [1], [0, 0, 1, 1], [], []>} : vector<2x32xf32>, vector<32x128xf32>, vector<2x128xf32> -> vector<2x128xf32>
    %c0_48 = arith.constant 0 : index
    %c0_49 = arith.constant 0 : index
    %124 = vector.load %arg10[%c0_48, %c0_49] : memref<1x128xf32, #tpu.memory_space<vmem>>, vector<1x128xf32>
    %125 = vector.broadcast %124 : vector<1x128xf32> to vector<2x128xf32>
    %126 = arith.addf %123, %125 : vector<2x128xf32>
    %cst_50 = arith.constant 0.000000e+00 : f32
    %127 = vector.broadcast %cst_50 : f32 to vector<2x128xf32>
    %128 = arith.subf %127, %126 : vector<2x128xf32>
    %129 = math.exp %128 : vector<2x128xf32>
    %cst_51 = arith.constant 1.000000e+00 : f32
    %130 = vector.broadcast %cst_51 : f32 to vector<2x128xf32>
    %131 = arith.addf %130, %129 : vector<2x128xf32>
    %132 = tpu.reciprocal %131 {approx = true} : vector<2x128xf32> -> vector<2x128xf32>
    %133 = arith.mulf %126, %132 : vector<2x128xf32>
    %134 = arith.addf %120, %50 : vector<32x128xf32>
    %135 = vector.shape_cast %134 : vector<32x128xf32> to vector<2x16x128xf32>
    %136 = vector.shape_cast %133 : vector<2x128xf32> to vector<2x1x128xf32>
    %137 = vector.broadcast %136 : vector<2x1x128xf32> to vector<2x16x128xf32>
    %138 = arith.addf %135, %137 : vector<2x16x128xf32>
    %cst_52 = arith.constant 0.000000e+00 : f32
    %139 = vector.broadcast %cst_52 : f32 to vector<2x16x128xf32>
    %140 = arith.subf %139, %138 : vector<2x16x128xf32>
    %141 = math.exp %140 : vector<2x16x128xf32>
    %cst_53 = arith.constant 1.000000e+00 : f32
    %142 = vector.broadcast %cst_53 : f32 to vector<2x16x128xf32>
    %143 = arith.addf %142, %141 : vector<2x16x128xf32>
    %144 = tpu.reciprocal %143 {approx = true} : vector<2x16x128xf32> -> vector<2x16x128xf32>
    %145 = arith.mulf %138, %144 : vector<2x16x128xf32>
    %c0_54 = arith.constant 0 : index
    %c0_55 = arith.constant 0 : index
    %c0_56 = arith.constant 0 : index
    %146 = vector.load %arg11[%c0_54, %c0_55, %c0_56] : memref<2x16x128xf32, #tpu.memory_space<vmem>>, vector<2x16x128xf32>
    tpu.vector_store %arg11[%c0_54, %c0_55, %c0_56], %145 {strides = array<i32>} : memref<2x16x128xf32, #tpu.memory_space<vmem>>, vector<2x16x128xf32>,
    return
  }
}

</mosaic_0001>

<bundles_post_ra>
// kernel: tpu_custom_call.1
= control target key start
LH: loop header
LB: loop body
LE: loop exit
PB: predicated region body
PF: predicated region fallthrough
CT: control target
= control target key end

     0   :  { %16 = vsyncpa [#allocation3], 0  ;;  %s2496_s0 = inlined_call_operand.vmem [shape: bf16[2,18,64], index: 0, kind: input, shape index: {}]   ;;  %s2497_s1 = inlined_call_operand.vmem [shape: f32[2,32], index: 1, kind: input, shape index: {}]   ;;  %s2498_s2 = inlined_call_operand.hbm [shape: bf16[192,256], index: 2, kind: input, shape index: {}]   ;;  %s2499_s3 = inlined_call_operand.hbm [shape: bf16[384,128], index: 3, kind: input, shape index: {}]   ;;  %s2500_s4 = inlined_call_operand.vmem [shape: f32[1,128], index: 4, kind: input, shape index: {}]   ;;  %s2501_s5 = inlined_call_operand.vmem [shape: f32[1,128], index: 5, kind: input, shape index: {}]   ;;  %s2502_s6 = inlined_call_operand.vmem [shape: f32[1,128], index: 6, kind: input, shape index: {}]   ;;  %s2503_s7 = inlined_call_operand.vmem [shape: f32[1,128], index: 7, kind: input, shape index: {}]   ;;  %s2504_s8 = inlined_call_operand.vmem [shape: f32[1,128], index: 8, kind: input, shape index: {}]   ;;  %s2505_s9 = inlined_call_operand.vmem [shape: f32[32,128], index: 9, kind: input, shape index: {}]   ;;  %s2506_s10 = inlined_call_operand.vmem [shape: f32[1,128], index: 10, kind: input, shape index: {}]   ;;  %s2507_s11 = inlined_call_operand.hbm [shape: f32[2,16,128], index: 11, kind: output, shape index: {}]  }
   0x1   :  { %17 = vsyncpa [#allocation6], 0 }
   0x2   :  { %18 = vsyncpa [#allocation4], 0  ;;  %s1960_s17 = smov [#allocation2]  }
   0x3   :  { %s28_s18 = sshll.u32 %s1960_s17, 4  ;;  %s29_s18 = int_to_ptr.vmem [resolvable:$true] %s28_s18 }
   0x4   :  { %s1902_s19 = scalar_lea.vmem %s29_s18, 3072  ;;  %p1907_p1 = scmp.lt.s32.totalorder %s29_s18, %s29_s18 }
   0x5   :  { %p1903_p0 = scmp.ne.s32.totalorder %s29_s18, %s1902_s19  ;;  %p1908_p2 = scmp.lt.s32.totalorder %s1902_s19, %s1902_s19 }
   0x7   :  { %p1909_p3 = por %p1908_p2, %p1907_p1 }
   0x9   :  { %p1910_p4 = pnand %p1909_p3, %p1903_p0 }
   0xb   :  { %1913 = shalt.err (!%p1910_p4)
}
   0xc   :  { %s1961_s20 = smov 128   ;;  %s1962_s21 = smov 8  }
   0xd   :  { %34 = dma.hbm_to_vmem [thread:$0]  %s2498_s2, 3072, %s29_s18, [#allocation3], %s1961_s20, %s1961_s20, %s1962_s21  }
   0xe   :  { %s1963_s24 = smov [#allocation5]  }
   0xf   :  { %s40_s25 = sshll.u32 %s1963_s24, 4  ;;  %s41_s25 = int_to_ptr.vmem [resolvable:$true] %s40_s25 }
  0x10   :  { %s1922_s26 = scalar_lea.vmem %s41_s25, 3072  ;;  %p1927_p6 = scmp.lt.s32.totalorder %s41_s25, %s41_s25 }
  0x11   :  { %p1923_p5 = scmp.ne.s32.totalorder %s41_s25, %s1922_s26  ;;  %p1928_p7 = scmp.lt.s32.totalorder %s1922_s26, %s1922_s26 }
  0x13   :  { %p1929_p8 = por %p1928_p7, %p1927_p6 }
  0x15   :  { %p1930_p9 = pnand %p1929_p8, %p1923_p5 }
  0x17   :  { %1933 = shalt.err (!%p1930_p9)
}
  0x18   :  { %s1964_s27 = smov 64   ;;  %s1965_s28 = smov 4  }
  0x19   :  { %46 = dma.hbm_to_vmem [thread:$0]  %s2499_s3, 3072, %s41_s25, [#allocation6], %s1964_s27, %s1964_s27, %s1965_s28  }
  0x1a   :  { %1954 = dma.done.wait [#allocation3], 3072  }
  0x1b   :  { %1955 = vsyncadd [#allocation3], 4294964224 }
  0x1c   :  { %1956 = dma.done.wait [#allocation6], 3072  }
  0x1d   :  { %1957 = vsyncadd [#allocation6], 4294964224  ;;  %vm345_vm0 = vsmask.f32 3328  ;;  %vm346_vm1 = vsmask.f32 7440  ;;  %v68_v42 = vlaneseq }
  0x1e   :  { %v2046_v0 = vld [vmem:[%s2496_s0] sm:$0xf]  ;;  %v2051_v1 = vld [vmem:[%s2496_s0 + $0x4] sm:$0xf]  ;;  %v2056_v2 = vld [vmem:[%s2496_s0 + $0x8] sm:$0x1] }
  0x1f   :  { %v349_v3 = vshrl.u32 %v2046_v0, 16  ;;  %v352_v4 = vshll.u32 %v2046_v0, 16  ;;  %v358_v5 = vshll.u32 %v2051_v1, 16  ;;  %v362_v6 = vshrl.u32 %v2051_v1, 16  ;;  %v2065_v7 = vld [vmem:[%s2496_s0 + $0xc] sm:$0xf]  ;;  %vm2087_vm2 = vmor %vm345_vm0, %vm346_vm1 }
  0x20   :  { %v368_v8 = vshll.u32 %v2056_v2, 16  ;;  %v2071_v9 = vld [vmem:[%s2496_s0 + $0x10] sm:$0xf]  ;;  %v2076_v10 = vld [vmem:[%s2496_s0 + $0x14] sm:$0x1]  ;;  %v373_v11 = vshrl.u32 %v2065_v7, 16  ;;  %v1493_v12 = vcombine.low %v2046_v0, %v2051_v1 }
  0x21   :  { %v351_v13 = vrot.slane %v349_v3, 4  ;;  %v354_v14 = vrot.slane %v352_v4, 5  ;;  %v360_v15 = vrot.slane %v358_v5, 5  ;;  %v364_v16 = vrot.slane %v362_v6, 4  ;;  %v1792_v21 = vld [vmem:[#allocation2 + $0x74] ss:$8 sps:$4 sm:$0xff]  }
  0x22   :  { %v370_v17 = vrot.slane %v368_v8, 5  ;;  %v375_v18 = vrot.slane %v373_v11, 4  ;;  %v376_v19 = vshll.u32 %v2065_v7, 16  ;;  %v382_v20 = vshll.u32 %v2071_v9, 16  ;;  %v1794_v26 = vld [vmem:[#allocation2 + $0x70] ss:$8 sps:$4 sm:$0xff]   ;;  %604 = vmatprep.subr.bf16.mxu0 %v1792_v21 }
  0x23   :  { %v355_v22 = vor.u32 %v354_v14, %v351_v13  ;;  %v365_v23 = vor.u32 %v364_v16, %v360_v15  ;;  %v386_v24 = vshrl.u32 %v2071_v9, 16  ;;  %v392_v25 = vshll.u32 %v2076_v10, 16  ;;  %v1795_v30 = vld [vmem:[#allocation2 + $0x64] ss:$8 sps:$4 sm:$0xff]   ;;  %605 = vmatpush1.bf16.msra.mxu0 %v1794_v26  ;;  %v1797_v35 = vld [vmem:[#allocation2 + $0x60] ss:$8 sps:$4 sm:$0xff]  }
  0x24   :  { %v378_v28 = vrot.slane %v376_v19, 5  ;;  %v384_v29 = vrot.slane %v382_v20, 5  ;;  %v1494_v31 = vcombine.low %v2065_v7, %v2071_v9  ;;  %606 = vmatprep.subr.bf16.mxu0 %v1795_v30  ;;  %v1798_v38 = vld [vmem:[#allocation2 + $0x54] ss:$8 sps:$4 sm:$0xff]   ;;  %v1800_v46 = vld [vmem:[#allocation2 + $0x50] ss:$8 sps:$4 sm:$0xff]  }
  0x25   :  { %v356_v32 = vrot.slane %v355_v22, 4  ;;  %v366_v33 = vrot.slane %v365_v23, 4  ;;  %v388_v34 = vrot.slane %v386_v24, 4  ;;  %v394_v37 = vrot.slane %v392_v25, 5  ;;  %v1801_v49 = vld [vmem:[#allocation2 + $0x44] ss:$8 sps:$4 sm:$0xff]  }
  0x26   :  { %v379_v36 = vor.u32 %v378_v28, %v375_v18  ;;  %vm404_vm3 = vcmask 1042432   ;;  %v419_v48 = vrot.slane %v2076_v10, 5  ;;  %vm405_vm4 = vcmask 1046532   ;;  %v1803_v58 = vld [vmem:[#allocation2 + $0x40] ss:$8 sps:$4 sm:$0xff]  }
  0x27   :  { %v361_v39 = vsel %vm2087_vm2, %v356_v32, %v360_v15  ;;  %v371_v40 = vsel %vm2087_vm2, %v366_v33, %v370_v17  ;;  %v389_v41 = vor.u32 %v388_v34, %v384_v29  ;;  %607 = vmatpush1.bf16.msra.mxu0 %v1797_v35  ;;  %v416_v50 = vrot.slane %v2071_v9, 5  ;;  %vm2109_vm5 = vmor %vm404_vm3, %vm405_vm4  ;;  %v1804_v61 = vld [vmem:[#allocation2 + $0x34] ss:$8 sps:$4 sm:$0xff]   ;;  %v1806_v6 = vld [vmem:[#allocation2 + $0x30] ss:$8 sps:$4 sm:$0xff]  }
  0x28   :  { %v1495_v43 = vcombine.low %v361_v39, %v371_v40  ;;  %v380_v44 = vrot.slane %v379_v36, 4  ;;  %608 = vmatprep.subr.bf16.mxu0 %v1798_v38  ;;  %v2104_v52 = vshrl.u32 %v68_v42, 7  ;;  %v409_v54 = vrot.slane %v2051_v1, 5  ;;  %v1807_v10 = vld [vmem:[#allocation2 + $0x24] ss:$8 sps:$4 sm:$0xff]  }
  0x29   :  { %v390_v45 = vrot.slane %v389_v41, 4  ;;  %v418_v55 = vrot.slane %v416_v50, 4  ;;  %v1966_v56 = vmov 0.0   ;;  %v86_v57 = vand.u32 127, %v68_v42  ;;  %v1809_v13 = vld [vmem:[#allocation2 + $0x20] ss:$8 sps:$4 sm:$0xff]  }
  0x2a   :  { %435 = vrot.lane.b32.xlu0 %v1495_v43, %s1964_s27  ;;  %v385_v47 = vsel %vm2087_vm2, %v380_v44, %v384_v29  ;;  %1679 = vmatprep.subr.mxu1 %v1966_v56  ;;  %v84_v60 = vadd.s32 120, %v2104_v52  ;;  %v411_v4 = vrot.slane %v409_v54, 4  ;;  %v412_v5 = vrot.slane %v2056_v2, 5  ;;  %v396_v2 = vld [vmem:[%s2496_s0] sm:$0xe]  ;;  %v1298_v8 = vld [vmem:[%s2505_s9 + $0x8] sm:$0xff] }
  0x2b   :  { %v395_v51 = vsel %vm2087_vm2, %v390_v45, %v394_v37  ;;  %609 = vmatpush1.bf16.msra.mxu0 %v1800_v46  ;;  %v420_v62 = vsel %vm2109_vm5, %v418_v55, %v419_v48  ;;  %v2117_v63 = vand.u32 7, %v86_v57  ;;  %vm445_vm7 = vcmask 523264   ;;  %v397_v14 = vld [vmem:[%s2496_s0 + $0xc] sm:$0xe]  ;;  %v1810_v15 = vld [vmem:[#allocation2 + $0x14] ss:$8 sps:$4 sm:$0xff]  }
  0x2c   :  { %v1496_v53 = vcombine.low %v385_v47, %v395_v51  ;;  %610 = vmatprep.subr.bf16.mxu0 %v1801_v49  ;;  %v196_v3 = vand.u32 7, %v84_v60  ;;  %v1967_v11 = vmov 1.0   ;;  %v1491_v16 = vrot.slane %v396_v2, 9  ;;  %v1812_v21 = vld [vmem:[#allocation2 + $0x10] ss:$8 sps:$4 sm:$0xff]  }
  0x2d   :  { %v413_v17 = vsel %vm2109_vm5, %v411_v4, %v412_v5  ;;  %v1492_v18 = vrot.slane %v397_v14, 9  ;;  %v1813_v24 = vld [vmem:[#allocation2 + $0x4] ss:$8 sps:$4 sm:$0xff]   ;;  %v1815_v25 = vld [vmem:[#allocation2] ss:$8 sps:$4 sm:$0xff]   ;;  %v83_v39 = vadd.s32 112, %v2104_v52 }
  0x2e   :  { %437 = vrot.lane.b32.xlu0 %v1496_v53, %s1964_s27  ;;  %vm2121_vm6 = vcmp.eq.s32.totalorder %v196_v3, %v2117_v63  ;;  %v410_v19 = vsel %vm2109_vm5, %v1491_v16, %v409_v54  ;;  %v1816_v26 = vld [vmem:[#allocation2 + $0xb4] ss:$8 sps:$4 sm:$0xff]   ;;  %v1818_v27 = vld [vmem:[#allocation2 + $0xb0] ss:$8 sps:$4 sm:$0xff]   ;;  %v1819_v28 = vld [vmem:[#allocation2 + $0xa4] ss:$8 sps:$4 sm:$0xff]  }
  0x2f   :  { %611 = vmatpush1.bf16.msra.mxu0 %v1803_v58  ;;  %1680 = vmatpush3.msk.msra.mxu1 %vm2121_vm6, %v1967_v11  ;;  %v417_v20 = vsel %vm2109_vm5, %v1492_v18, %v416_v50  ;;  %v1497_v22 = vcombine.low %v410_v19, %v413_v17  ;;  %v1821_v29 = vld [vmem:[#allocation2 + $0xa0] ss:$8 sps:$4 sm:$0xff]   ;;  %v1822_v30 = vld [vmem:[#allocation2 + $0x94] ss:$8 sps:$4 sm:$0xff]   ;;  %v1824_v32 = vld [vmem:[#allocation2 + $0x90] ss:$8 sps:$4 sm:$0xff]  }
  0x30   :  { %612 = vmatprep.subr.bf16.mxu0 %v1804_v61  ;;  %1681 = vmatprep.subr.mxu1 %v1966_v56  ;;  %v1498_v23 = vcombine.low %v417_v20, %v420_v62  ;;  %v1825_v33 = vld [vmem:[#allocation2 + $0x84] ss:$8 sps:$4 sm:$0xff]   ;;  %v1827_v34 = vld [vmem:[#allocation2 + $0x80] ss:$8 sps:$4 sm:$0xff]   ;;  %v189_v40 = vand.u32 7, %v83_v39  ;;  %v82_v41 = vadd.s32 104, %v2104_v52 }
  0x31   :  { %1523 = vmatprep.mubr.msk.bf16.mxu0 %vm445_vm7, %v1497_v22  ;;  %v79_v44 = vadd.s32 80, %v2104_v52  ;;  %v78_v47 = vadd.s32 72, %v2104_v52  ;;  %v77_v50 = vadd.s32 64, %v2104_v52  ;;  %v76_v54 = vadd.s32 56, %v2104_v52  ;;  %v1296_v0 = vld [vmem:[%s2497_s1] sm:$0x3] }
  0x32   :  { %vm2154_vm8 = vcmp.eq.s32.totalorder %v189_v40, %v2117_v63  ;;  %v182_v1 = vand.u32 7, %v82_v41  ;;  %v75_v58 = vadd.s32 48, %v2104_v52  ;;  %v74_v61 = vadd.s32 40, %v2104_v52 }
  0x33   :  { %613 = vmatpush1.bf16.msra.mxu0 %v1806_v6  ;;  %1682 = vmatpush3.msk.msra.mxu1 %vm2154_vm8, %v1967_v11  ;;  %v161_v46 = vand.u32 7, %v79_v44  ;;  %v154_v49 = vand.u32 7, %v78_v47  ;;  %v147_v53 = vand.u32 7, %v77_v50  ;;  %v140_v57 = vand.u32 7, %v76_v54  ;;  %v1830_v54 = vld [vmem:[#allocation5 + $0x78] sm:$0xff]  }
  0x34   :  { %614 = vmatprep.subr.bf16.mxu0 %v1807_v10  ;;  %1683 = vmatprep.subr.mxu1 %v1966_v56  ;;  %vm2164_vm9 = vcmp.eq.s32.totalorder %v182_v1, %v2117_v63  ;;  %v133_v60 = vand.u32 7, %v75_v58  ;;  %v126_v3 = vand.u32 7, %v74_v61  ;;  %v73_v4 = vadd.s32 32, %v2104_v52  ;;  %v1832_v58 = vld [vmem:[#allocation5 + $0xb8] sm:$0xff]   ;;  %v1835_v61 = vld [vmem:[#allocation5 + $0xb0] sm:$0xff]  }
  0x35   :  { %1684 = vmatpush3.msk.msra.mxu1 %vm2164_vm9, %v1967_v11  ;;  %vm2194_vm12 = vcmp.eq.s32.totalorder %v161_v46, %v2117_v63  ;;  %vm2204_vm13 = vcmp.eq.s32.totalorder %v154_v49, %v2117_v63  ;;  %vm2214_vm14 = vcmp.eq.s32.totalorder %v147_v53, %v2117_v63  ;;  %vm2224_vm15 = vcmp.eq.s32.totalorder %v140_v57, %v2117_v63  ;;  %v1831_v57 = vld [vmem:[#allocation5 + $0x38] sm:$0xff]  }
  0x36   :  { %1685 = vmatprep.subr.mxu1 %v1966_v56  ;;  %vm2234_vm0 = vcmp.eq.s32.totalorder %v133_v60, %v2117_v63  ;;  %vm2244_vm1 = vcmp.eq.s32.totalorder %v126_v3, %v2117_v63  ;;  %v2540_v5 = vmov 0  ;;  %v119_v6 = vand.u32 7, %v73_v4  ;;  %v1833_v60 = vld [vmem:[#allocation5 + $0x70] sm:$0xff]   ;;  %v1836_v4 = vld [vmem:[#allocation5 + $0x68] sm:$0xff]  }
  0x37   :  { %615 = vmatpush1.bf16.msra.mxu0 %v1809_v13  ;;  %v2541_v5 = vsel %vm2244_vm1, 4294967295, %v2540_v5  ;;  %v72_v10 = vadd.s32 24, %v2104_v52  ;;  %v2542_v13 = vmov 0  ;;  %v71_v14 = vadd.s32 16, %v2104_v52  ;;  %v1834_v3 = vld [vmem:[#allocation5 + $0x30] sm:$0xff]  }
  0x38   :  { %616 = vmatprep.subr.bf16.mxu0 %v1810_v15  ;;  %vm2254_vm2 = vcmp.eq.s32.totalorder %v119_v6, %v2117_v63  ;;  %v70_v15 = vadd.s32 8, %v2104_v52  ;;  %v2544_v16 = vmov 0  ;;  %v91_v18 = vand.u32 7, %v2104_v52  ;;  %v1838_v6 = vld [vmem:[#allocation5 + $0xa8] sm:$0xff]  }
  0x39   :  { %v2543_v13 = vsel %vm2254_vm2, 4294967295, %v2542_v13  ;;  %v112_v2 = vand.u32 7, %v72_v10  ;;  %v105_v17 = vand.u32 7, %v71_v14  ;;  %vm2508_vm4 = vmmov 0   ;;  %v1837_v10 = vld [vmem:[#allocation5 + $0x28] sm:$0xff]   ;;  %v1841_v14 = vld [vmem:[#allocation5 + $0xa0] sm:$0xff]  }
  0x3a   :  { %1711 = vmatprep.mubr.msk.f32.mxu1 %vm2508_vm4, %v1966_v56  ;;  %v98_v19 = vand.u32 7, %v70_v15  ;;  %v2546_v20 = vmov 0  ;;  %vm2291_vm4 = vcmp.eq.s32.totalorder %v91_v18, %v2117_v63  ;;  %v2550_v22 = vmov 0  ;;  %v1840_v15 = vld [vmem:[#allocation5 + $0x20] sm:$0xff]   ;;  %v1844_v18 = vld [vmem:[#allocation5 + $0x98] sm:$0xff]  }
  0x3b   :  { %617 = vmatpush1.bf16.msra.mxu0 %v1812_v21  ;;  %vm2265_vm3 = vcmp.eq.s32.totalorder %v112_v2, %v2117_v63  ;;  %vm2277_vm5 = vcmp.eq.s32.totalorder %v105_v17, %v2117_v63  ;;  %v2548_v21 = vmov 0  ;;  %v2551_v22 = vsel %vm2291_vm4, 4294967295, %v2550_v22  ;;  %v1839_v2 = vld [vmem:[#allocation5 + $0x60] sm:$0xff]   ;;  %v1842_v17 = vld [vmem:[#allocation5 + $0x58] sm:$0xff]  }
  0x3c   :  { %618 = vmatprep.subr.bf16.mxu0 %v1813_v24  ;;  %v2545_v16 = vsel %vm2265_vm3, 4294967295, %v2544_v16  ;;  %v2547_v20 = vsel %vm2277_vm5, 4294967295, %v2546_v20 }
  0x3f   :  { %619 = vmatpush1.bf16.msra.mxu0 %v1815_v25 }
  0x40   :  { %628 = vmatprep.subr.bf16.mxu0 %v1816_v26 }
  0x43   :  { %629 = vmatpush2.bf16.msra.mxu0 %v1818_v27 }
  0x44   :  { %630 = vmatprep.subr.bf16.mxu0 %v1819_v28 }
  0x47   :  { %631 = vmatpush2.bf16.msra.mxu0 %v1821_v29 }
  0x48   :  { %632 = vmatprep.subr.bf16.mxu0 %v1822_v30 }
  0x4b   :  { %633 = vmatpush2.bf16.msra.mxu0 %v1824_v32 }
  0x4c   :  { %634 = vmatprep.subr.bf16.mxu0 %v1825_v33 }
  0x4f   :  { %635 = vmatpush2.bf16.msra.mxu0 %v1827_v34 }
  0x50   :  { %1714 = vmatprep.subr.bf16.mxu0 %v1832_v58 }
  0x9c   :  { %v436_v35 = vpop.permute.xlu0 %435 }
  0x9d   :  { %v448_v36 = vsel %vm445_vm7, %v1493_v12, %v436_v35  ;;  %v81_v12 = vadd.s32 96, %v2104_v52 }
  0x9e   :  { %637 = vmatmul.mubr.bf16.vlgmr.msra.gmra.mxu0 %v448_v36 }
  0x9f   :  { %1524 = vmatprep.mubr.msk.bf16.mxu0 %vm445_vm7, %v1498_v23  ;;  %v175_v9 = vand.u32 7, %v81_v12  ;;  %1715 = vmatpush3.bf16.msra.mxu0 %v1832_v58  ;;  %v1542_v58 = vld [vmem:[%s2500_s4] ss:$0 sm:$0xff] }
  0xa0   :  { %v438_v37 = vpop.permute.xlu0 %437  ;;  %1716 = vmatprep.subr.bf16.mxu0 %v1835_v61 }
  0xa1   :  { %v452_v38 = vsel %vm445_vm7, %v1494_v31, %v438_v37  ;;  %v80_v31 = vadd.s32 88, %v2104_v52  ;;  %vm2174_vm10 = vcmp.eq.s32.totalorder %v175_v9, %v2117_v63  ;;  %vm2285_vm7 = vcmp.eq.s32.totalorder %v98_v19, %v2117_v63  ;;  %v1843_v19 = vld [vmem:[#allocation5 + $0x18] sm:$0xff]  }
  0xa2   :  { %1686 = vmatpush3.msk.msra.mxu1 %vm2174_vm10, %v1967_v11  ;;  %v2549_v21 = vsel %vm2285_vm7, 4294967295, %v2548_v21 }
  0xa3   :  { %v168_v43 = vand.u32 7, %v80_v31  ;;  %1687 = vmatprep.subr.mxu1 %v1966_v56  ;;  %1717 = vmatpush3.bf16.msra.mxu0 %v1835_v61 }
  0xa4   :  { %1718 = vmatprep.subr.bf16.mxu0 %v1838_v6 }
  0xa5   :  { %vm2184_vm11 = vcmp.eq.s32.totalorder %v168_v43, %v2117_v63 }
  0xa6   :  { %647 = vmatmul.mubr.bf16.gmra.mxu0 %v452_v38  ;;  %1688 = vmatpush3.msk.msra.mxu1 %vm2184_vm11, %v1967_v11 }
  0xa7   :  { %1689 = vmatprep.subr.mxu1 %v1966_v56  ;;  %1719 = vmatpush3.bf16.msra.mxu0 %v1838_v6 }
  0xa8   :  { %1690 = vmatpush3.msk.msra.mxu1 %vm2194_vm12, %v1967_v11  ;;  %1720 = vmatprep.subr.bf16.mxu0 %v1841_v14 }
  0xa9   :  { %1691 = vmatprep.subr.mxu1 %v1966_v56 }
  0xaa   :  { %1692 = vmatpush3.msk.msra.mxu1 %vm2204_vm13, %v1967_v11 }
  0xab   :  { %1693 = vmatprep.subr.mxu1 %v1966_v56  ;;  %1721 = vmatpush3.bf16.msra.mxu0 %v1841_v14 }
  0xac   :  { %1694 = vmatpush3.msk.msra.mxu1 %vm2214_vm14, %v1967_v11  ;;  %1722 = vmatprep.subr.bf16.mxu0 %v1844_v18 }
  0xad   :  { %1695 = vmatprep.subr.mxu1 %v1966_v56 }
  0xae   :  { %1696 = vmatpush3.msk.msra.mxu1 %vm2224_vm15, %v1967_v11 }
  0xaf   :  { %1697 = vmatprep.subr.mxu1 %v1966_v56  ;;  %1723 = vmatpush3.bf16.msra.mxu0 %v1844_v18 }
  0xb0   :  { %1698 = vmatpush3.msk.msra.mxu1 %vm2234_vm0, %v1967_v11 }
  0xb1   :  { %1699 = vmatprep.subr.mxu1 %v1966_v56 }
  0xb2   :  { %1700 = vmatpush3.msk.msra.mxu1 %vm2244_vm1, %v1967_v11 }
  0xb3   :  { %1701 = vmatprep.subr.mxu1 %v1966_v56 }
  0xb4   :  { %1702 = vmatpush3.msk.msra.mxu1 %vm2254_vm2, %v1967_v11 }
  0xb5   :  { %1703 = vmatprep.subr.mxu1 %v1966_v56 }
  0xb6   :  { %1704 = vmatpush3.msk.msra.mxu1 %vm2265_vm3, %v1967_v11  ;;  %vm1969_vm3 = vmmov 1  }
  0xb7   :  { %1705 = vmatprep.subr.mxu1 %v1966_v56 }
  0xb8   :  { %1706 = vmatpush3.msk.msra.mxu1 %vm2277_vm5, %v1967_v11  ;;  %vm848_vm5 = vcmask 1046528  }
  0xb9   :  { %1707 = vmatprep.subr.mxu1 %v1966_v56  ;;  %vm1576_vm1 = vmpackc.low %vm848_vm5, %vm1969_vm3 }
  0xba   :  { %1708 = vmatpush3.msk.msra.mxu1 %vm2285_vm7, %v1967_v11 }
  0xbb   :  { %1709 = vmatprep.subr.mxu1 %v1966_v56 }
  0xbc   :  { %1710 = vmatpush3.msk.msra.mxu1 %vm2291_vm4, %v1967_v11  ;;  %vm692_vm4 = vcmask 1040384  }
  0xbd   :  { %1619 = vmatprep.subr.bf16.mxu1 %v1830_v54  ;;  %vm1568_vm7 = vmneg %vm692_vm4 }
  0xbe   :  { %vm2349_vm2 = vmpackc.low %vm1969_vm3, %vm1568_vm7  ;;  %vm2554_vm3 = vmmov 0  }
 0x15e   :  { %v2302_v23 = vpop.f32.mrf.mxu0 }
 0x15f   :  { %v679_v28 = vmul.f32 %v2302_v23, %v2302_v23 }
 0x160   :  { %v2304_v24 = vpop.f32.mrf.mxu0 }
 0x162   :  { %v2306_v25 = vpop.f32.mrf.mxu0 }
 0x163   :  { %v680_v26 = vmul.f32 %v2306_v25, %v2306_v25  ;;  %v670_v29 = vadd.f32 %v2306_v25, %v2302_v23 }
 0x164   :  { %v2308_v63 = vpop.f32.mrf.mxu0 }
 0x165   :  { %v683_v33 = vadd.f32 %v680_v26, %v679_v28  ;;  %v1845_v26 = vld [vmem:[#allocation5 + $0x50] sm:$0xff]  }
 0x166   :  { %v2312_v27 = vpop.f32.mrf.mxu0  ;;  %v1847_v28 = vld [vmem:[#allocation5 + $0x90] sm:$0xff]  }
 0x167   :  { %v681_v30 = vmul.f32 %v2312_v27, %v2312_v27  ;;  %v671_v34 = vadd.f32 %v670_v29, %v2312_v27  ;;  %v1846_v29 = vld [vmem:[#allocation5 + $0x10] sm:$0xff]   ;;  %1724 = vmatprep.subr.bf16.mxu0 %v1847_v28 }
 0x168   :  { %v2320_v32 = vpop.f32.mrf.mxu0  ;;  %1725 = vmatpush3.bf16.msra.mxu0 %v1847_v28 }
 0x169   :  { %v684_v36 = vadd.f32 %v683_v33, %v681_v30  ;;  %v1848_v30 = vld [vmem:[#allocation5 + $0x48] sm:$0xff]  }
 0x16a   :  { %v2323_v35 = vpop.f32.mrf.mxu0  ;;  %v1850_v33 = vld [vmem:[#allocation5 + $0x88] sm:$0xff]  }
 0x16b   :  { %v672_v37 = vadd.f32 %v671_v34, %v2323_v35  ;;  %v682_v38 = vmul.f32 %v2323_v35, %v2323_v35  ;;  %v1849_v34 = vld [vmem:[#allocation5 + $0x8] sm:$0xff]   ;;  %1726 = vmatprep.subr.bf16.mxu0 %v1850_v33 }
 0x16c   :  { %1727 = vmatpush3.bf16.msra.mxu0 %v1850_v33  ;;  %v2447_v7 = vpop.f32.mrf.mxu0 }
 0x16d   :  { %v673_v39 = vrot.slane %v672_v37, 4  ;;  %v685_v40 = vadd.f32 %v684_v36, %v682_v38  ;;  %v1851_v36 = vld [vmem:[#allocation5 + $0x40] sm:$0xff]  }
 0x16e   :  { %v1853_v38 = vld [vmem:[#allocation5 + $0x80] sm:$0xff]  }
 0x16f   :  { %v674_v41 = vadd.f32 %v673_v39, %v672_v37  ;;  %v686_v1 = vrot.slane %v685_v40, 4  ;;  %v1852_v37 = vld [vmem:[#allocation5] sm:$0xff]   ;;  %1728 = vmatprep.subr.bf16.mxu0 %v1853_v38 }
 0x170   :  { %1729 = vmatpush3.bf16.msra.mxu0 %v1853_v38 }
 0x171   :  { %v675_v12 = vrot.slane %v674_v41, 2  ;;  %v687_v9 = vadd.f32 %v686_v1, %v685_v40  ;;  %1769 = vmatprep.subr.mxu0 %v1966_v56 }
 0x173   :  { %v676_v31 = vadd.f32 %v675_v12, %v674_v41  ;;  %v688_v43 = vrot.slane %v687_v9, 2 }
 0x175   :  { %v677_v44 = vrot.slane %v676_v31, 1  ;;  %v689_v46 = vadd.f32 %v688_v43, %v687_v9  ;;  %v2332_v43 = vsub.s32 0, %v2104_v52 }
 0x177   :  { %v690_v47 = vrot.slane %v689_v46, 1  ;;  %v678_v49 = vadd.f32 %v677_v44, %v676_v31 }
 0x179   :  { %v691_v50 = vadd.f32 %v690_v47, %v689_v46  ;;  %v782_v46 = vsub.s32 1, %v2104_v52 }
 0x17b   :  { %v693_v53 = vsel %vm692_vm4, %v678_v49, %v691_v50 }
 0x17c   :  { %1712 = vmatmul.mubr.f32.vlgmr.msra.gmra.mxu1 %v693_v53 }
 0x17d   :  { %1620 = vmatpush3.bf16.msra.mxu1 %v1831_v57 }
 0x17e   :  { %1621 = vmatprep.subr.bf16.mxu1 %v1833_v60 }
 0x181   :  { %1622 = vmatpush3.bf16.msra.mxu1 %v1834_v3 }
 0x182   :  { %1623 = vmatprep.subr.bf16.mxu1 %v1836_v4 }
 0x185   :  { %1624 = vmatpush3.bf16.msra.mxu1 %v1837_v10 }
 0x186   :  { %1625 = vmatprep.subr.bf16.mxu1 %v1839_v2 }
 0x189   :  { %1626 = vmatpush3.bf16.msra.mxu1 %v1840_v15 }
 0x18a   :  { %1627 = vmatprep.subr.bf16.mxu1 %v1842_v17 }
 0x18d   :  { %1628 = vmatpush3.bf16.msra.mxu1 %v1843_v19 }
 0x18e   :  { %1629 = vmatprep.subr.bf16.mxu1 %v1845_v26 }
 0x191   :  { %1630 = vmatpush3.bf16.msra.mxu1 %v1846_v29 }
 0x192   :  { %1631 = vmatprep.subr.bf16.mxu1 %v1848_v30 }
 0x195   :  { %1632 = vmatpush3.bf16.msra.mxu1 %v1849_v34 }
 0x196   :  { %1633 = vmatprep.subr.bf16.mxu1 %v1851_v36 }
 0x199   :  { %1634 = vmatpush3.bf16.msra.mxu1 %v1852_v37 }
 0x19a   :  { %1734 = vmatprep.subr.mxu1 %v1966_v56 }
 0x23c   :  { %v760_v39 = vpop.f32.mrf.mxu1 }
 0x23d   :  { %v764_v40 = vmul.f32 0.001953125, %v760_v39 }
 0x23e   :  { %v1713_v41 = vpop.f32.mrf.mxu1 }
 0x23f   :  { %v765_v1 = vmul.f32 %v764_v40, %v764_v40  ;;  %v773_v44 = vrot.slane %v764_v40, %v2332_v43 }
 0x241   :  { %v767_v12 = vrot.slane %v765_v1, 7  ;;  %v774_v49 = vsub.f32 %v2302_v23, %v773_v44  ;;  %v775_v50 = vsub.f32 %v2306_v25, %v773_v44  ;;  %v776_v53 = vsub.f32 %v2312_v27, %v773_v44  ;;  %v1543_v23 = vld [vmem:[%s2501_s5] ss:$0 sm:$0xff] }
 0x242   :  { %v777_v54 = vsub.f32 %v2323_v35, %v773_v44 }
 0x243   :  { %v769_v9 = vsub.f32 %v764_v40, %v767_v12 }
 0x245   :  { %v778_v31 = vadd.f32 1e-05, %v769_v9 }
 0x247   :  { %1854 = vrsqrt.f32 %v778_v31 }
 0x254   :  { %v1855_v47 = vpop.eup %1854 }
 0x255   :  { %v783_v57 = vrot.slane %v1855_v47, %v782_v46 }
 0x257   :  { %v786_v60 = vmul.f32 %v783_v57, %v776_v53  ;;  %v787_v61 = vmul.f32 %v783_v57, %v777_v54  ;;  %v784_v3 = vmul.f32 %v783_v57, %v774_v49  ;;  %v785_v4 = vmul.f32 %v783_v57, %v775_v50 }
 0x259   :  { %v796_v25 = vmul.f32 %v1542_v58, %v786_v60  ;;  %v797_v6 = vmul.f32 %v1542_v58, %v787_v61  ;;  %v794_v27 = vmul.f32 %v1542_v58, %v784_v3  ;;  %v795_v10 = vmul.f32 %v1542_v58, %v785_v4 }
 0x25b   :  { %v804_v35 = vadd.f32 %v1543_v23, %v794_v27  ;;  %v805_v2 = vadd.f32 %v1543_v23, %v795_v10  ;;  %v806_v14 = vadd.f32 %v1543_v23, %v796_v25  ;;  %v807_v15 = vadd.f32 %v1543_v23, %v797_v6 }
 0x25d   :  { %v808_v17 = vsub.f32 0.0, %v804_v35  ;;  %v809_v18 = vsub.f32 0.0, %v805_v2  ;;  %v810_v19 = vsub.f32 0.0, %v806_v14  ;;  %v811_v26 = vsub.f32 0.0, %v807_v15 }
 0x25f   :  { %v812_v28 = vmul.f32 1.442695, %v808_v17  ;;  %v814_v29 = vmul.f32 1.442695, %v809_v18  ;;  %v816_v30 = vmul.f32 1.442695, %v810_v19 }
 0x260   :  { %v818_v33 = vmul.f32 1.442695, %v811_v26  ;;  %v1300_v18 = vld [vmem:[%s2505_s9 + $0x18] sm:$0xff]  ;;  %v1299_v19 = vld [vmem:[%s2505_s9 + $0x10] sm:$0xff] }
 0x261   :  { %1856 = vpow2.f32 %v812_v28 }
 0x262   :  { %1858 = vpow2.f32 %v814_v29  ;;  %v1297_v29 = vld [vmem:[%s2505_s9] sm:$0xff] }
 0x263   :  { %1860 = vpow2.f32 %v816_v30 }
 0x264   :  { %1862 = vpow2.f32 %v818_v33 }
 0x26e   :  { %v1857_v34 = vpop.eup %1856 }
 0x26f   :  { %v1859_v36 = vpop.eup %1858  ;;  %v820_v37 = vadd.f32 1.0, %v1857_v34 }
 0x270   :  { %v1861_v38 = vpop.eup %1860  ;;  %v821_v39 = vadd.f32 1.0, %v1859_v36 }
 0x271   :  { %v1863_v40 = vpop.eup %1862  ;;  %1864 = vrcp.f32 %v820_v37  ;;  %v822_v41 = vadd.f32 1.0, %v1861_v38 }
 0x272   :  { %1866 = vrcp.f32 %v821_v39  ;;  %v823_v1 = vadd.f32 1.0, %v1863_v40 }
 0x273   :  { %1868 = vrcp.f32 %v822_v41 }
 0x274   :  { %1870 = vrcp.f32 %v823_v1 }
 0x27e   :  { %v1865_v12 = vpop.eup %1864 }
 0x27f   :  { %v1867_v9 = vpop.eup %1866  ;;  %v828_v31 = vmul.f32 %v1865_v12, %v804_v35 }
 0x280   :  { %v1869_v44 = vpop.eup %1868  ;;  %v829_v47 = vmul.f32 %v1867_v9, %v805_v2 }
 0x281   :  { %v1871_v49 = vpop.eup %1870  ;;  %v836_v50 = vrot.slane %v828_v31, 7  ;;  %v830_v53 = vmul.f32 %v1869_v44, %v806_v14  ;;  %v849_v54 = vrot.slane %v828_v31, 1 }
 0x282   :  { %v837_v57 = vrot.slane %v829_v47, 7  ;;  %v862_v58 = vpack.c.bf16 %v829_v47, %v828_v31  ;;  %v831_v60 = vmul.f32 %v1871_v49, %v807_v15  ;;  %v850_v61 = vrot.slane %v829_v47, 1 }
 0x283   :  { %v852_v4 = vrot.slane %v830_v53, 1  ;;  %v839_v14 = vrot.slane %v830_v53, 7 }
 0x284   :  { %1091 = vmatprep.mubr.bf16.mxu1 %v862_v58  ;;  %v838_v23 = vsel %vm692_vm4, %v836_v50, %v837_v57  ;;  %v851_v25 = vsel %vm848_vm5, %v849_v54, %v850_v61  ;;  %v853_v6 = vrot.slane %v831_v60, 1  ;;  %v865_v2 = vpack.c.bf16 %v831_v60, %v830_v53 }
 0x285   :  { %v1570_v27 = vpack.c.bf16 %v838_v23, %v836_v50  ;;  %v1577_v10 = vpack.c.bf16 %v850_v61, %v851_v25  ;;  %v840_v15 = vrot.slane %v831_v60, 7 }
 0x286   :  { %v854_v35 = vsel %vm848_vm5, %v852_v4, %v853_v6 }
 0x287   :  { %1571 = vmatmul.mubr.msk.bf16.vlgmr.msra.gmra.mxu1 %vm2349_vm2, %v1570_v27  ;;  %1730 = vmatprep.mubr.msk.bf16.mxu0 %vm1576_vm1, %v1577_v10  ;;  %v1580_v17 = vpack.c.bf16 %v853_v6, %v854_v35  ;;  %v841_v26 = vsel %vm692_vm4, %v839_v14, %v840_v15  ;;  %v1600_v35 = vld [vmem:[%s2506_s10] ss:$0 sm:$0xff] }
 0x288   :  { %1099 = vmatprep.mubr.bf16.mxu1 %v865_v2  ;;  %1735 = vmatpush3.msk.msra.mxu1 %vm2121_vm6, %v1967_v11  ;;  %v1574_v28 = vpack.c.bf16 %v841_v26, %v839_v14  ;;  %vm1308_vm6 = vcmask 261120  }
 0x289   :  { %1731 = vmatmul.mubr.msk.bf16.vlgmr.msra.gmra.mxu0 %vm1576_vm1, %v1580_v17  ;;  %1736 = vmatprep.subr.mxu1 %v1966_v56 }
 0x28a   :  { %1770 = vmatpush3.msra.mxu0 %v1300_v18  ;;  %1777 = vmatprep.mubr.msk.f32.mxu0 %vm2554_vm3, %v1966_v56 }
 0x28b   :  { %1771 = vmatprep.subr.mxu0 %v1966_v56  ;;  %1737 = vmatpush3.msk.msra.mxu1 %vm2154_vm8, %v1967_v11  ;;  %vm2555_vm8 = vnez %v2541_v5 }
 0x28c   :  { %1772 = vmatpush3.msra.mxu0 %v1299_v19  ;;  %1738 = vmatprep.subr.mxu1 %v1966_v56 }
 0x28d   :  { %1773 = vmatprep.subr.mxu0 %v1966_v56  ;;  %1739 = vmatpush3.msk.msra.mxu1 %vm2164_vm9, %v1967_v11  ;;  %vm2556_vm9 = vnez %v2543_v13 }
 0x28e   :  { %1774 = vmatpush3.msra.mxu0 %v1298_v8  ;;  %1740 = vmatprep.subr.mxu1 %v1966_v56 }
 0x28f   :  { %1575 = vmatmul.mubr.msk.bf16.gmra.mxu1 %vm2349_vm2, %v1574_v28  ;;  %1775 = vmatprep.subr.mxu0 %v1966_v56 }
 0x290   :  { %1776 = vmatpush3.msra.mxu0 %v1297_v29  ;;  %1741 = vmatpush3.msk.msra.mxu1 %vm2174_vm10, %v1967_v11  ;;  %vm2557_vm10 = vnez %v2545_v16 }
 0x291   :  { %1778 = vmatmul.mubr.msk.f32.vlgmr.msra.gmra.mxu0 %vm1308_vm6, %v1296_v0  ;;  %1742 = vmatprep.subr.mxu1 %v1966_v56 }
 0x292   :  { %1743 = vmatpush3.msk.msra.mxu1 %vm2184_vm11, %v1967_v11  ;;  %1766 = vmatprep.mubr.msk.f32.mxu1 %vm2554_vm3, %v1966_v56  ;;  %vm2558_vm11 = vnez %v2547_v20 }
 0x293   :  { %1744 = vmatprep.subr.mxu1 %v1966_v56 }
 0x294   :  { %1745 = vmatpush3.msk.msra.mxu1 %vm2194_vm12, %v1967_v11  ;;  %vm2559_vm12 = vnez %v2549_v21 }
 0x295   :  { %1746 = vmatprep.subr.mxu1 %v1966_v56 }
 0x296   :  { %1747 = vmatpush3.msk.msra.mxu1 %vm2204_vm13, %v1967_v11  ;;  %vm2560_vm13 = vnez %v2551_v22 }
 0x297   :  { %1748 = vmatprep.subr.mxu1 %v1966_v56 }
 0x298   :  { %1749 = vmatpush3.msk.msra.mxu1 %vm2214_vm14, %v1967_v11 }
 0x299   :  { %1750 = vmatprep.subr.mxu1 %v1966_v56 }
 0x29a   :  { %1751 = vmatpush3.msk.msra.mxu1 %vm2224_vm15, %v1967_v11 }
 0x29b   :  { %1752 = vmatprep.subr.mxu1 %v1966_v56 }
 0x29c   :  { %1753 = vmatpush3.msk.msra.mxu1 %vm2234_vm0, %v1967_v11 }
 0x29d   :  { %1754 = vmatprep.subr.mxu1 %v1966_v56 }
 0x29e   :  { %1755 = vmatpush3.msk.msra.mxu1 %vm2555_vm8, %v1967_v11 }
 0x29f   :  { %1756 = vmatprep.subr.mxu1 %v1966_v56 }
 0x2a0   :  { %1757 = vmatpush3.msk.msra.mxu1 %vm2556_vm9, %v1967_v11 }
 0x2a1   :  { %1758 = vmatprep.subr.mxu1 %v1966_v56 }
 0x2a2   :  { %1759 = vmatpush3.msk.msra.mxu1 %vm2557_vm10, %v1967_v11 }
 0x2a3   :  { %1760 = vmatprep.subr.mxu1 %v1966_v56 }
 0x2a4   :  { %1761 = vmatpush3.msk.msra.mxu1 %vm2558_vm11, %v1967_v11 }
 0x2a5   :  { %1762 = vmatprep.subr.mxu1 %v1966_v56 }
 0x2a6   :  { %1763 = vmatpush3.msk.msra.mxu1 %vm2559_vm12, %v1967_v11 }
 0x2a7   :  { %1764 = vmatprep.subr.mxu1 %v1966_v56 }
 0x2a8   :  { %1765 = vmatpush3.msk.msra.mxu1 %vm2560_vm13, %v1967_v11 }
 0x347   :  { %v1635_v42 = vpop.f32.mrf.mxu1 }
 0x349   :  { %v1732_v45 = vpop.f32.mrf.mxu0  ;;  %v1636_v48 = vpop.f32.mrf.mxu1 }
 0x34a   :  { %v1637_v5 = vadd.f32 %v1636_v48, %v1635_v42  ;;  %v1970_v42 = vmov 1966171168  }
 0x34b   :  { %v1142_v51 = vpop.f32.mrf.mxu0  ;;  %v1638_v55 = vpop.f32.mrf.mxu1 }
 0x34c   :  { %v2451_v33 = vadd.f32 %v1637_v5, %v1142_v51 }
 0x34d   :  { %v1733_v59 = vpop.f32.mrf.mxu0  ;;  %v1639_v62 = vpop.f32.mrf.mxu1 }
 0x34e   :  { %v1640_v13 = vadd.f32 %v1639_v62, %v1638_v55  ;;  %v1168_v39 = vmul.f32 %v2451_v33, %v2451_v33 }
 0x34f   :  { %v1145_v16 = vpop.f32.mrf.mxu0  ;;  %v1641_v20 = vpop.f32.mrf.mxu1 }
 0x350   :  { %v2449_v21 = vadd.f32 %v1640_v13, %v1145_v16 }
 0x351   :  { %v1642_v56 = vpop.f32.mrf.mxu1  ;;  %v1378_v30 = vpop.f32.mrf.mxu0 }
 0x352   :  { %v1643_v11 = vadd.f32 %v1642_v56, %v1641_v20  ;;  %v1169_v36 = vmul.f32 %v2449_v21, %v2449_v21  ;;  %v1159_v40 = vadd.f32 %v2449_v21, %v2451_v33  ;;  %v1379_v2 = vadd.f32 %v1600_v35, %v1378_v30 }
 0x353   :  { %v1644_v22 = vpop.f32.mrf.mxu1  ;;  %v1779_v34 = vpop.f32.mrf.mxu0 }
 0x354   :  { %v2455_v37 = vadd.f32 %v1732_v45, %v1643_v11  ;;  %v1172_v12 = vadd.f32 %v1169_v36, %v1168_v39  ;;  %v1382_v14 = vsub.f32 0.0, %v1379_v2  ;;  %v1394_v45 = vunpack.c.l.s4 %v1970_v42  ;;  %v1598_v36 = vld [vmem:[%s2502_s6] ss:$0 sm:$0xff]  ;;  %s1971_s6 = smov [#allocation7]  }
 0x355   :  { %v1645_v38 = vpop.f32.mrf.mxu1 }
 0x356   :  { %v1170_v41 = vmul.f32 %v2455_v37, %v2455_v37  ;;  %v1646_v1 = vadd.f32 %v1645_v38, %v1644_v22  ;;  %v1160_v9 = vadd.f32 %v1159_v40, %v2455_v37  ;;  %v1383_v15 = vmul.f32 1.442695, %v1382_v14  ;;  %v1525_v38 = vld [vmem:[%s2504_s8] ss:$0 sm:$0xff] }
 0x357   :  { %v1395_v51 = vunpack.c.0.s8 %v1394_v45 }
 0x358   :  { %v1154_v31 = vadd.f32 %v1733_v59, %v1646_v1  ;;  %v1173_v44 = vadd.f32 %v1172_v12, %v1170_v41  ;;  %1872 = vpow2.f32 %v1383_v15 }
 0x359   :  { %v1398_v62 = vsub.s32 %v1395_v51, %v2104_v52 }
 0x35a   :  { %v1161_v47 = vadd.f32 %v1160_v9, %v1154_v31  ;;  %v1171_v49 = vmul.f32 %v1154_v31, %v1154_v31 }
 0x35c   :  { %v1162_v50 = vrot.slane %v1161_v47, 4  ;;  %v1174_v53 = vadd.f32 %v1173_v44, %v1171_v49  ;;  %v665_v44 = vadd.f32 %v1525_v38, %v2308_v63  ;;  %v667_v49 = vadd.f32 %v1525_v38, %v2447_v7 }
 0x35e   :  { %v1163_v54 = vadd.f32 %v1162_v50, %v1161_v47  ;;  %v1175_v57 = vrot.slane %v1174_v53, 4  ;;  %v666_v47 = vadd.f32 %v1525_v38, %v2320_v32 }
 0x360   :  { %v1164_v58 = vrot.slane %v1163_v54, 2  ;;  %v1176_v60 = vadd.f32 %v1175_v57, %v1174_v53 }
 0x362   :  { %v1165_v61 = vadd.f32 %v1164_v58, %v1163_v54  ;;  %v1177_v3 = vrot.slane %v1176_v60, 2 }
 0x364   :  { %v1166_v4 = vrot.slane %v1165_v61, 1  ;;  %v1178_v23 = vadd.f32 %v1177_v3, %v1176_v60 }
 0x365   :  { %v1873_v17 = vpop.eup %1872 }
 0x366   :  { %v1179_v25 = vrot.slane %v1178_v23, 1  ;;  %v1167_v6 = vadd.f32 %v1166_v4, %v1165_v61  ;;  %v1385_v18 = vadd.f32 1.0, %v1873_v17 }
 0x368   :  { %v1180_v27 = vadd.f32 %v1179_v25, %v1178_v23  ;;  %1874 = vrcp.f32 %v1385_v18 }
 0x36a   :  { %v1181_v10 = vsel %vm692_vm4, %v1167_v6, %v1180_v27 }
 0x36b   :  { %1767 = vmatmul.mubr.f32.vlgmr.msra.gmra.mxu1 %v1181_v10 }
 0x375   :  { %v1875_v55 = vpop.eup %1874 }
 0x376   :  { %v1387_v59 = vmul.f32 %v1875_v55, %v1379_v2 }
 0x378   :  { %v1399_v5 = vrot.slane %v1387_v59, %v1398_v62 }
 0x37a   :  { %v1400_v20 = vcombine.high %v1399_v5, %v1399_v5  ;;  %v1407_v1 = vrot.slane %v1399_v5, %v1398_v62 }
 0x37c   :  { %v1418_v58 = vrot.slane %v1407_v1, %v2332_v43 }
 0x42b   :  { %v1248_v19 = vpop.f32.mrf.mxu1 }
 0x42c   :  { %v1252_v26 = vmul.f32 0.001953125, %v1248_v19 }
 0x42d   :  { %v1768_v8 = vpop.f32.mrf.mxu1 }
 0x42e   :  { %v1253_v28 = vmul.f32 %v1252_v26, %v1252_v26  ;;  %v1261_v13 = vrot.slane %v1252_v26, %v2332_v43 }
 0x430   :  { %v1255_v29 = vrot.slane %v1253_v28, 7  ;;  %v1262_v56 = vsub.f32 %v2451_v33, %v1261_v13  ;;  %v1263_v30 = vsub.f32 %v2449_v21, %v1261_v13  ;;  %v1264_v11 = vsub.f32 %v2455_v37, %v1261_v13  ;;  %v1599_v37 = vld [vmem:[%s2503_s7] ss:$0 sm:$0xff]  ;;  %s1462_s7 = sshll.u32 %s1971_s6, 4  ;;  %s1463_s7 = int_to_ptr.vmem [resolvable:$true] %s1462_s7 }
 0x431   :  { %v1265_v22 = vsub.f32 %v1154_v31, %v1261_v13  ;;  %v1414_v21 = vrot.slane %v1400_v20, %v1398_v62  ;;  %v664_v31 = vadd.f32 %v1525_v38, %v2304_v24  ;;  %s1934_s8 = scalar_lea.vmem %s1463_s7, 512  ;;  %p1939_p11 = scmp.lt.s32.totalorder %s1463_s7, %s1463_s7 }
 0x432   :  { %v1257_v0 = vsub.f32 %v1252_v26, %v1255_v29  ;;  %p1935_p10 = scmp.ne.s32.totalorder %s1463_s7, %s1934_s8  ;;  %p1940_p12 = scmp.lt.s32.totalorder %s1934_s8, %s1934_s8 }
 0x433   :  { %v1422_v60 = vrot.slane %v1414_v21, %v2332_v43 }
 0x434   :  { %v1266_v48 = vadd.f32 1e-05, %v1257_v0  ;;  %p1941_p13 = por %p1940_p12, %p1939_p11 }
 0x436   :  { %1876 = vrsqrt.f32 %v1266_v48  ;;  %p1942_p0 = pnand %p1941_p13, %p1935_p10 }
 0x443   :  { %v1877_v16 = vpop.eup %1876 }
 0x444   :  { %v1271_v34 = vrot.slane %v1877_v16, %v782_v46 }
 0x446   :  { %v1272_v39 = vmul.f32 %v1271_v34, %v1262_v56  ;;  %v1273_v40 = vmul.f32 %v1271_v34, %v1263_v30  ;;  %v1274_v41 = vmul.f32 %v1271_v34, %v1264_v11  ;;  %v1275_v33 = vmul.f32 %v1271_v34, %v1265_v22 }
 0x448   :  { %v1282_v52 = vmul.f32 %v1598_v36, %v1272_v39  ;;  %v1283_v46 = vmul.f32 %v1598_v36, %v1273_v40  ;;  %v1284_v12 = vmul.f32 %v1598_v36, %v1274_v41  ;;  %v1285_v9 = vmul.f32 %v1598_v36, %v1275_v33 }
 0x44a   :  { %v1292_v50 = vadd.f32 %v1599_v37, %v1282_v52  ;;  %v1293_v53 = vadd.f32 %v1599_v37, %v1283_v46  ;;  %v1294_v54 = vadd.f32 %v1599_v37, %v1284_v12  ;;  %v1295_v57 = vadd.f32 %v1599_v37, %v1285_v9 }
 0x44c   :  { %v1388_v61 = vadd.f32 %v1292_v50, %v664_v31  ;;  %v1389_v3 = vadd.f32 %v1293_v53, %v665_v44  ;;  %v1390_v4 = vadd.f32 %v1294_v54, %v666_v47  ;;  %v1391_v23 = vadd.f32 %v1295_v57, %v667_v49 }
 0x44e   :  { %v1425_v25 = vadd.f32 %v1418_v58, %v1388_v61  ;;  %v1426_v24 = vadd.f32 %v1418_v58, %v1389_v3  ;;  %v1427_v6 = vadd.f32 %v1422_v60, %v1390_v4  ;;  %v1428_v63 = vadd.f32 %v1422_v60, %v1391_v23 }
 0x450   :  { %v1429_v27 = vsub.f32 0.0, %v1425_v25  ;;  %v1430_v32 = vsub.f32 0.0, %v1426_v24  ;;  %v1431_v10 = vsub.f32 0.0, %v1427_v6  ;;  %v1432_v7 = vsub.f32 0.0, %v1428_v63 }
 0x452   :  { %v1433_v35 = vmul.f32 1.442695, %v1429_v27  ;;  %v1435_v2 = vmul.f32 1.442695, %v1430_v32  ;;  %v1437_v14 = vmul.f32 1.442695, %v1431_v10 }
 0x453   :  { %v1439_v15 = vmul.f32 1.442695, %v1432_v7 }
 0x454   :  { %1878 = vpow2.f32 %v1433_v35 }
 0x455   :  { %1880 = vpow2.f32 %v1435_v2 }
 0x456   :  { %1882 = vpow2.f32 %v1437_v14 }
 0x457   :  { %1884 = vpow2.f32 %v1439_v15 }
 0x461   :  { %v1879_v43 = vpop.eup %1878 }
 0x462   :  { %v1881_v17 = vpop.eup %1880  ;;  %v1441_v18 = vadd.f32 1.0, %v1879_v43 }
 0x463   :  { %v1883_v19 = vpop.eup %1882  ;;  %v1442_v26 = vadd.f32 1.0, %v1881_v17 }
 0x464   :  { %v1885_v8 = vpop.eup %1884  ;;  %v1443_v28 = vadd.f32 1.0, %v1883_v19  ;;  %1886 = vrcp.f32 %v1441_v18 }
 0x465   :  { %v1444_v29 = vadd.f32 1.0, %v1885_v8  ;;  %1888 = vrcp.f32 %v1442_v26 }
 0x466   :  { %1890 = vrcp.f32 %v1443_v28 }
 0x467   :  { %1892 = vrcp.f32 %v1444_v29 }
 0x471   :  { %v1887_v0 = vpop.eup %1886 }
 0x472   :  { %v1889_v42 = vpop.eup %1888  ;;  %v1449_v45 = vmul.f32 %v1887_v0, %v1425_v25 }
 0x473   :  { %v1891_v48 = vpop.eup %1890  ;;  %v1450_v51 = vmul.f32 %v1889_v42, %v1426_v24 }
 0x474   :  { %v1893_v55 = vpop.eup %1892  ;;  %v1451_v59 = vmul.f32 %v1891_v48, %v1427_v6  ;;  %1453 = vst [vmem:[#allocation7] sm:$0xff] %v1449_v45 }
 0x475   :  { %v1452_v62 = vmul.f32 %v1893_v55, %v1428_v63  ;;  %1454 = vst [vmem:[#allocation7 + $0x8] sm:$0xff] %v1450_v51 }
 0x476   :  { %1455 = vst [vmem:[#allocation7 + $0x10] sm:$0xff] %v1451_v59 }
 0x477   :  { %1456 = vst [vmem:[#allocation7 + $0x18] sm:$0xff] %v1452_v62 }
 0x478   :  { %1945 = shalt.err (!%p1942_p0)
}
 0x479   :  { %1468 = dma.vmem_to_hbm [thread:$0]  %s1463_s7, 512, %s2507_s11, [#allocation4], %s1961_s20, %s1961_s20, %s1962_s21  }
 0x47a   :  { %1958 = dma.done.wait [#allocation4], 512  }
 0x47b   :  { %1959 = vsyncadd [#allocation4], 4294966784 }
 0x47c   :  { %1472 = vsyncpa [#allocation3], 1 }
 0x47d   :  { %1473 = vsyncpa [#allocation6], 1 }
 0x47e   :  { %1474 = vsyncpa [#allocation4], 1 }

</bundles_post_ra>
